<compile_context>
chip_gen: v6e
topology: v6e:2x2x1
jax: 0.10.0
libtpu: 0.0.40
codegen_flags: <defaults>
</compile_context>

<pallas_src>
import functools

import jax
import jax.numpy as jnp
from jax.experimental import pallas as pl
from jax.experimental.pallas import tpu as pltpu


def actor_kernel(x_ref, w1_ref, b1_ref, w2_ref, b2_ref,
                 wmu_ref, bmu_ref, wls_ref, bls_ref,
                 mu_ref, ls_ref):
    # Feature-major layout: x_ref is [state_dim, tb] (batch on the lane axis).
    x = x_ref[...].astype(jnp.bfloat16)
    # Hidden layer 1: W1[h1, sd] @ x[sd, tb]  (bf16 MXU, f32 accumulate) + bias + ReLU
    h = jnp.dot(w1_ref[...], x, preferred_element_type=jnp.float32)
    h = jnp.maximum(h + b1_ref[...], 0.0)
    # Hidden layer 2
    h = jnp.dot(w2_ref[...], h.astype(jnp.bfloat16), preferred_element_type=jnp.float32)
    h = jnp.maximum(h + b2_ref[...], 0.0)
    hb = h.astype(jnp.bfloat16)
    # Output heads: mu and log_std (clamp fused into the store epilogue).
    mu = jnp.dot(wmu_ref[...], hb, preferred_element_type=jnp.float32) + bmu_ref[...]
    ls = jnp.dot(wls_ref[...], hb, preferred_element_type=jnp.float32) + bls_ref[...]
    mu_ref[...] = mu
    ls_ref[...] = jnp.clip(ls, -20.0, 2.0)


def _num_tensorcores():
    """2 TensorCores per chip on v7x, 1 on v5e/v6e."""
    try:
        kind = jax.devices()[0].device_kind.lower()
        if "v7" in kind:
            return 2
    except Exception:
        pass
    return 1


def _pick_batch_tile(B, block_b, num_tc):
    # Batch sits on the 128-lane axis: a tile must be a multiple of 128 unless
    # it spans the full batch dimension.
    if num_tc >= 2 and B % (128 * num_tc) == 0 and B // num_tc <= block_b:
        return B // num_tc                       # one grid step per TensorCore (v7x)
    if B <= block_b:
        return B                                 # single max-size block (v5e / v6e)
    return max(128, (min(block_b, B) // 128) * 128)


@functools.partial(jax.jit, static_argnames=("block_b",))
def actor_forward(state, params, *, block_b=1024):
    """state: [B, state_dim] float32. Returns (mu, log_std), each [B, action_dim]."""
    w1, b1, w2, b2, wo, bo = params
    B, state_dim = state.shape
    h1 = w1.shape[0]
    h2 = w2.shape[0]
    out_dim = wo.shape[0]
    action_dim = out_dim // 2

    num_tc = _num_tensorcores()
    tb = _pick_batch_tile(B, block_b, num_tc)
    grid = (pl.cdiv(B, tb),)

    # One-time transpose so batch lies on the lane axis inside the kernel.
    x_t = state.T                               # [state_dim, B]
    # Split the output layer into the mu / log_std heads (rows 0:ad / ad:2ad of
    # the PyTorch [out, in] weight == chunk(2, dim=-1) of the output).
    wmu, wls = wo[:action_dim], wo[action_dim:]
    bmu, bls = bo[:action_dim], bo[action_dim:]

    # Resident (non-tiled) operands: constant block index across the grid, so
    # Pallas DMAs them into VMEM once and reuses them every step.
    def resident(a):
        nd = a.ndim
        return pl.BlockSpec(a.shape, lambda i, _nd=nd: (0,) * _nd)

    flops = 2 * B * (state_dim * h1 + h1 * h2 + h2 * out_dim)
    bytes_accessed = (
        state.size * state.dtype.itemsize
        + sum(a.size * a.dtype.itemsize for a in (w1, b1, w2, b2, wo, bo))
        + B * out_dim * 4
    )

    mu_t, ls_t = pl.pallas_call(
        actor_kernel,
        grid=grid,
        in_specs=[
            pl.BlockSpec((state_dim, tb), lambda i: (0, i)),   # batch-tiled activations
            resident(w1), resident(b1),
            resident(w2), resident(b2),
            resident(wmu), resident(bmu),
            resident(wls), resident(bls),
        ],
        out_specs=(
            pl.BlockSpec((action_dim, tb), lambda i: (0, i)),  # mu  [action_dim, B]
            pl.BlockSpec((action_dim, tb), lambda i: (0, i)),  # log_std
        ),
        out_shape=(
            jax.ShapeDtypeStruct((action_dim, B), jnp.float32),
            jax.ShapeDtypeStruct((action_dim, B), jnp.float32),
        ),
        compiler_params=pltpu.CompilerParams(
            dimension_semantics=("parallel",)),
        cost_estimate=pl.CostEstimate(
            flops=flops, transcendentals=0, bytes_accessed=bytes_accessed),
    )(x_t, w1, b1, w2, b2, wmu, bmu, wls, bls)

    # Back to the module's [B, action_dim] convention (tiny, fused by XLA).
    return mu_t.T, ls_t.T


def xavier_uniform(key, fan_out, fan_in):
    limit = jnp.sqrt(6.0 / (fan_in + fan_out))
    return jax.random.uniform(key, (fan_out, fan_in), jnp.float32, -limit, limit)


def init_actor_params(key, state_dim, action_dim, hidden_dims):
    """Mirrors Actor._init_weights: xavier_uniform hidden weights, zero biases,
    output layer ~ U(-0.003, 0.003) with zero bias.  Weights kept PyTorch-native
    [out, in] (feature-major kernel layout), stored in bf16; biases are column
    vectors [out, 1] so they broadcast over the lane (batch) axis."""
    h1, h2 = hidden_dims
    k1, k2, k3 = jax.random.split(key, 3)
    w1 = xavier_uniform(k1, h1, state_dim).astype(jnp.bfloat16)
    b1 = jnp.zeros((h1, 1), jnp.float32)
    w2 = xavier_uniform(k2, h2, h1).astype(jnp.bfloat16)
    b2 = jnp.zeros((h2, 1), jnp.float32)
    wo = jax.random.uniform(
        k3, (action_dim * 2, h2), jnp.float32, -0.003, 0.003).astype(jnp.bfloat16)
    bo = jnp.zeros((action_dim * 2, 1), jnp.float32)
    return (w1, b1, w2, b2, wo, bo)


def actor_forward_ref(state, params):
    """Pure-JAX reference (same bf16-weight / f32-accumulate math)."""
    w1, b1, w2, b2, wo, bo = params
    x = state.astype(jnp.bfloat16)
    h = jnp.maximum(
        jnp.dot(x, w1.T, preferred_element_type=jnp.float32) + b1.T, 0.0)
    h = jnp.maximum(
        jnp.dot(h.astype(jnp.bfloat16), w2.T, preferred_element_type=jnp.float32) + b2.T,
        0.0)
    out = jnp.dot(h.astype(jnp.bfloat16), wo.T, preferred_element_type=jnp.float32) + bo.T
    a_dim = wo.shape[0] // 2
    return out[:, :a_dim], jnp.clip(out[:, a_dim:], -20.0, 2.0)


def _check(state, params, block_b):
    mu, log_std = actor_forward(state, params, block_b=block_b)
    jax.block_until_ready((mu, log_std))
    mu_ref, log_std_ref = actor_forward_ref(state, params)
    a_dim = params[4].shape[0] // 2
    assert mu.shape == (state.shape[0], a_dim)
    assert log_std.shape == (state.shape[0], a_dim)
    assert jnp.allclose(mu, mu_ref, atol=1e-4, rtol=1e-4)
    assert jnp.allclose(log_std, log_std_ref, atol=1e-4, rtol=1e-4)
    assert bool(jnp.all(log_std <= 2.0)) and bool(jnp.all(log_std >= -20.0))


if __name__ == "__main__":
    key = jax.random.PRNGKey(0)
    k_state, k_params, k_big = jax.random.split(key, 3)

    state_dim = 16
    action_dim = 4
    hidden_dims = (32, 32)
    params = init_actor_params(k_params, state_dim, action_dim, hidden_dims)

    # Small shape consistent with the module (single grid step, full-batch tile).
    state_small = jax.random.normal(k_state, (2, state_dim), jnp.float32)
    _check(state_small, params, block_b=1024)

    # Larger batch exercising the batch-tiled grid (128-multiple tiles,
    # 2 steps -> both TensorCores on v7x, resident weights).
    state_big = jax.random.normal(k_big, (512, state_dim), jnp.float32)
    _check(state_big, params, block_b=256)

    # TODO(synk): Actor.sample() (torch.distributions.Normal.rsample + tanh-squash
    # log-prob) is a host-RNG sampling path, not part of the forward hot path;
    # omitted from the kernel.
    print("KERNEL_OK")
</pallas_src>

<mosaic_0001>
module attributes {stable_mosaic.version = 11 : i64} {
  func.func @actor_kernel(%arg0: i32, %arg1: memref<16x2xf32, #tpu.memory_space<vmem>>, %arg2: memref<32x16xbf16, #tpu.memory_space<vmem>>, %arg3: memref<32x1xf32, #tpu.memory_space<vmem>>, %arg4: memref<32x32xbf16, #tpu.memory_space<vmem>>, %arg5: memref<32x1xf32, #tpu.memory_space<vmem>>, %arg6: memref<4x32xbf16, #tpu.memory_space<vmem>>, %arg7: memref<4x1xf32, #tpu.memory_space<vmem>>, %arg8: memref<4x32xbf16, #tpu.memory_space<vmem>>, %arg9: memref<4x1xf32, #tpu.memory_space<vmem>>, %arg10: memref<4x2xf32, #tpu.memory_space<vmem>>, %arg11: memref<4x2xf32, #tpu.memory_space<vmem>>) attributes {dimension_semantics = [#tpu.dimension_semantics<parallel>], iteration_bounds = array<i64: 1>, scalar_prefetch = 0 : i64, scratch_operands = 0 : i64, tpu.core_type = #tpu.core_type<tc>, window_params = [{transform_indices = @transform_0, window_bounds = array<i64: 16, 2>}, {pipeline_mode = #tpu.pipeline_mode<synchronous>, transform_indices = @transform_1, window_bounds = array<i64: 32, 16>}, {pipeline_mode = #tpu.pipeline_mode<synchronous>, transform_indices = @transform_2, window_bounds = array<i64: 32, 1>}, {pipeline_mode = #tpu.pipeline_mode<synchronous>, transform_indices = @transform_3, window_bounds = array<i64: 32, 32>}, {pipeline_mode = #tpu.pipeline_mode<synchronous>, transform_indices = @transform_4, window_bounds = array<i64: 32, 1>}, {pipeline_mode = #tpu.pipeline_mode<synchronous>, transform_indices = @transform_5, window_bounds = array<i64: 4, 32>}, {pipeline_mode = #tpu.pipeline_mode<synchronous>, transform_indices = @transform_6, window_bounds = array<i64: 4, 1>}, {pipeline_mode = #tpu.pipeline_mode<synchronous>, transform_indices = @transform_7, window_bounds = array<i64: 4, 32>}, {pipeline_mode = #tpu.pipeline_mode<synchronous>, transform_indices = @transform_8, window_bounds = array<i64: 4, 1>}, {transform_indices = @transform_9, window_bounds = array<i64: 4, 2>}, {transform_indices = @transform_10, window_bounds = array<i64: 4, 2>}]} {
    %c0 = arith.constant 0 : index
    %c0_0 = arith.constant 0 : index
    %0 = vector.load %arg1[%c0, %c0_0] : memref<16x2xf32, #tpu.memory_space<vmem>>, vector<16x2xf32>
    %1 = arith.truncf %0 : vector<16x2xf32> to vector<16x2xbf16>
    %c0_1 = arith.constant 0 : index
    %c0_2 = arith.constant 0 : index
    %2 = vector.load %arg2[%c0_1, %c0_2] : memref<32x16xbf16, #tpu.memory_space<vmem>>, vector<32x16xbf16>
    %cst = arith.constant dense<0.000000e+00> : vector<32x2xf32>
    %3 = tpu.matmul %2, %1, %cst {dimension_numbers = #tpu.dot_dimension_numbers<[1], [0], [0], [1], [0, 0, 1, 1], [], []>} : vector<32x16xbf16>, vector<16x2xbf16>, vector<32x2xf32> -> vector<32x2xf32>
    %c0_3 = arith.constant 0 : index
    %c0_4 = arith.constant 0 : index
    %4 = vector.load %arg3[%c0_3, %c0_4] : memref<32x1xf32, #tpu.memory_space<vmem>>, vector<32x1xf32>
    %5 = vector.broadcast %4 : vector<32x1xf32> to vector<32x2xf32>
    %6 = arith.addf %3, %5 : vector<32x2xf32>
    %cst_5 = arith.constant 0.000000e+00 : f32
    %7 = vector.broadcast %cst_5 : f32 to vector<32x2xf32>
    %8 = arith.maximumf %6, %7 : vector<32x2xf32>
    %c0_6 = arith.constant 0 : index
    %c0_7 = arith.constant 0 : index
    %9 = vector.load %arg4[%c0_6, %c0_7] : memref<32x32xbf16, #tpu.memory_space<vmem>>, vector<32x32xbf16>
    %10 = arith.truncf %8 : vector<32x2xf32> to vector<32x2xbf16>
    %cst_8 = arith.constant dense<0.000000e+00> : vector<32x2xf32>
    %11 = tpu.matmul %9, %10, %cst_8 {dimension_numbers = #tpu.dot_dimension_numbers<[1], [0], [0], [1], [0, 0, 1, 1], [], []>} : vector<32x32xbf16>, vector<32x2xbf16>, vector<32x2xf32> -> vector<32x2xf32>
    %c0_9 = arith.constant 0 : index
    %c0_10 = arith.constant 0 : index
    %12 = vector.load %arg5[%c0_9, %c0_10] : memref<32x1xf32, #tpu.memory_space<vmem>>, vector<32x1xf32>
    %13 = vector.broadcast %12 : vector<32x1xf32> to vector<32x2xf32>
    %14 = arith.addf %11, %13 : vector<32x2xf32>
    %cst_11 = arith.constant 0.000000e+00 : f32
    %15 = vector.broadcast %cst_11 : f32 to vector<32x2xf32>
    %16 = arith.maximumf %14, %15 : vector<32x2xf32>
    %17 = arith.truncf %16 : vector<32x2xf32> to vector<32x2xbf16>
    %c0_12 = arith.constant 0 : index
    %c0_13 = arith.constant 0 : index
    %18 = vector.load %arg6[%c0_12, %c0_13] : memref<4x32xbf16, #tpu.memory_space<vmem>>, vector<4x32xbf16>
    %cst_14 = arith.constant dense<0.000000e+00> : vector<4x2xf32>
    %19 = tpu.matmul %18, %17, %cst_14 {dimension_numbers = #tpu.dot_dimension_numbers<[1], [0], [0], [1], [0, 0, 1, 1], [], []>} : vector<4x32xbf16>, vector<32x2xbf16>, vector<4x2xf32> -> vector<4x2xf32>
    %c0_15 = arith.constant 0 : index
    %c0_16 = arith.constant 0 : index
    %20 = vector.load %arg7[%c0_15, %c0_16] : memref<4x1xf32, #tpu.memory_space<vmem>>, vector<4x1xf32>
    %21 = vector.broadcast %20 : vector<4x1xf32> to vector<4x2xf32>
    %22 = arith.addf %19, %21 : vector<4x2xf32>
    %c0_17 = arith.constant 0 : index
    %c0_18 = arith.constant 0 : index
    %23 = vector.load %arg8[%c0_17, %c0_18] : memref<4x32xbf16, #tpu.memory_space<vmem>>, vector<4x32xbf16>
    %cst_19 = arith.constant dense<0.000000e+00> : vector<4x2xf32>
    %24 = tpu.matmul %23, %17, %cst_19 {dimension_numbers = #tpu.dot_dimension_numbers<[1], [0], [0], [1], [0, 0, 1, 1], [], []>} : vector<4x32xbf16>, vector<32x2xbf16>, vector<4x2xf32> -> vector<4x2xf32>
    %c0_20 = arith.constant 0 : index
    %c0_21 = arith.constant 0 : index
    %25 = vector.load %arg9[%c0_20, %c0_21] : memref<4x1xf32, #tpu.memory_space<vmem>>, vector<4x1xf32>
    %26 = vector.broadcast %25 : vector<4x1xf32> to vector<4x2xf32>
    %27 = arith.addf %24, %26 : vector<4x2xf32>
    %c0_22 = arith.constant 0 : index
    %c0_23 = arith.constant 0 : index
    %28 = vector.load %arg10[%c0_22, %c0_23] : memref<4x2xf32, #tpu.memory_space<vmem>>, vector<4x2xf32>
    tpu.vector_store %arg10[%c0_22, %c0_23], %22 {strides = array<i32>} : memref<4x2xf32, #tpu.memory_space<vmem>>, vector<4x2xf32>,
    %cst_24 = arith.constant -2.000000e+01 : f32
    %cst_25 = arith.constant 2.000000e+00 : f32
    %29 = vector.broadcast %cst_24 : f32 to vector<4x2xf32>
    %30 = arith.maximumf %29, %27 : vector<4x2xf32>
    %31 = vector.broadcast %cst_25 : f32 to vector<4x2xf32>
    %32 = arith.minimumf %31, %30 : vector<4x2xf32>
    %c0_26 = arith.constant 0 : index
    %c0_27 = arith.constant 0 : index
    %33 = vector.load %arg11[%c0_26, %c0_27] : memref<4x2xf32, #tpu.memory_space<vmem>>, vector<4x2xf32>
    tpu.vector_store %arg11[%c0_26, %c0_27], %32 {strides = array<i32>} : memref<4x2xf32, #tpu.memory_space<vmem>>, vector<4x2xf32>,
    return
  }
  func.func @transform_0(%arg0: i32) -> (i32, i32) {
    %c0_i32 = arith.constant 0 : i32
    %c0_i32_0 = arith.constant 0 : i32
    return %c0_i32, %arg0 : i32, i32
  }
  func.func @transform_1(%arg0: i32) -> (i32, i32) {
    %c0_i32 = arith.constant 0 : i32
    %c0_i32_0 = arith.constant 0 : i32
    %c0_i32_1 = arith.constant 0 : i32
    return %c0_i32, %c0_i32_0 : i32, i32
  }
  func.func @transform_2(%arg0: i32) -> (i32, i32) {
    %c0_i32 = arith.constant 0 : i32
    %c0_i32_0 = arith.constant 0 : i32
    %c0_i32_1 = arith.constant 0 : i32
    return %c0_i32, %c0_i32_0 : i32, i32
  }
  func.func @transform_3(%arg0: i32) -> (i32, i32) {
    %c0_i32 = arith.constant 0 : i32
    %c0_i32_0 = arith.constant 0 : i32
    %c0_i32_1 = arith.constant 0 : i32
    return %c0_i32, %c0_i32_0 : i32, i32
  }
  func.func @transform_4(%arg0: i32) -> (i32, i32) {
    %c0_i32 = arith.constant 0 : i32
    %c0_i32_0 = arith.constant 0 : i32
    %c0_i32_1 = arith.constant 0 : i32
    return %c0_i32, %c0_i32_0 : i32, i32
  }
  func.func @transform_5(%arg0: i32) -> (i32, i32) {
    %c0_i32 = arith.constant 0 : i32
    %c0_i32_0 = arith.constant 0 : i32
    %c0_i32_1 = arith.constant 0 : i32
    return %c0_i32, %c0_i32_0 : i32, i32
  }
  func.func @transform_6(%arg0: i32) -> (i32, i32) {
    %c0_i32 = arith.constant 0 : i32
    %c0_i32_0 = arith.constant 0 : i32
    %c0_i32_1 = arith.constant 0 : i32
    return %c0_i32, %c0_i32_0 : i32, i32
  }
  func.func @transform_7(%arg0: i32) -> (i32, i32) {
    %c0_i32 = arith.constant 0 : i32
    %c0_i32_0 = arith.constant 0 : i32
    %c0_i32_1 = arith.constant 0 : i32
    return %c0_i32, %c0_i32_0 : i32, i32
  }
  func.func @transform_8(%arg0: i32) -> (i32, i32) {
    %c0_i32 = arith.constant 0 : i32
    %c0_i32_0 = arith.constant 0 : i32
    %c0_i32_1 = arith.constant 0 : i32
    return %c0_i32, %c0_i32_0 : i32, i32
  }
  func.func @transform_9(%arg0: i32) -> (i32, i32) {
    %c0_i32 = arith.constant 0 : i32
    %c0_i32_0 = arith.constant 0 : i32
    return %c0_i32, %arg0 : i32, i32
  }
  func.func @transform_10(%arg0: i32) -> (i32, i32) {
    %c0_i32 = arith.constant 0 : i32
    %c0_i32_0 = arith.constant 0 : i32
    return %c0_i32, %arg0 : i32, i32
  }
}

</mosaic_0001>

<bundles_post_ra>
// kernel: actor_forward.1
= control target key start
LH: loop header
LB: loop body
LE: loop exit
PB: predicated region body
PF: predicated region fallthrough
CT: control target
= control target key end

     0   :  { %vm76_vm0 = vcmask 130048   ;;  %v413_v2 = vmov 0   ;;  %vm176_vm1 = vcmask 261120   ;;  %v414_v36 = vmov 0.0   ;;  %s537_s0 = inlined_call_operand.vmem [shape: f32[16,2], index: 0, kind: input, shape index: {}]   ;;  %s538_s1 = inlined_call_operand.vmem [shape: bf16[32,16], index: 1, kind: input, shape index: {}]   ;;  %s539_s2 = inlined_call_operand.vmem [shape: f32[32,1], index: 2, kind: input, shape index: {}]   ;;  %s540_s4 = inlined_call_operand.vmem [shape: f32[32,1], index: 4, kind: input, shape index: {}]   ;;  %s541_s8 = inlined_call_operand.vmem [shape: f32[4,1], index: 8, kind: input, shape index: {}]   ;;  %s542_s6 = inlined_call_operand.vmem [shape: f32[4,1], index: 6, kind: input, shape index: {}]   ;;  %s543_s3 = inlined_call_operand.vmem [shape: bf16[32,32], index: 3, kind: input, shape index: {}]   ;;  %s544_s5 = inlined_call_operand.vmem [shape: bf16[4,32], index: 5, kind: input, shape index: {}]   ;;  %s545_s7 = inlined_call_operand.vmem [shape: bf16[4,32], index: 7, kind: input, shape index: {}]   ;;  %s546_s9 = inlined_call_operand.vmem [shape: f32[4,2], index: 9, kind: output, shape index: {0}]   ;;  %s547_s10 = inlined_call_operand.vmem [shape: f32[4,2], index: 10, kind: output, shape index: {1}]  }
   0x1   :  { %v35_v0 = vld [vmem:[%s537_s0] sm:$0xff]  ;;  %v36_v1 = vld [vmem:[%s537_s0 + $0x8] sm:$0xff]  ;;  %407 = vset.pattern.permute.xlu0 %v413_v2  ;;  %408 = vset.pattern.permute.xlu1 %v413_v2  ;;  %v44_v5 = vld [vmem:[%s539_s2 + $0x10] sm:$0xff]  ;;  %vm415_vm2 = vmmov 0   ;;  %vm338_vm3 = vcmask 11264  }
   0x2   :  { %v37_v3 = vpack.c.bf16 %v36_v1, %v35_v0  ;;  %v409_v4 = vld [vmem:[%s538_s1] sm:$0xff]   ;;  %v410_v6 = vld [vmem:[%s538_s1 + $0x8] sm:$0xff]   ;;  %58 = vperm.xlu0 %407, %v44_v5   ;;  %v45_v8 = vld [vmem:[%s539_s2 + $0x18] sm:$0xff] }
   0x3   :  { %376 = vmatprep.mubr.msk.bf16.mxu0 %vm76_vm0, %v409_v4  ;;  %v42_v7 = vld [vmem:[%s539_s2] sm:$0xff]  ;;  %v43_v9 = vld [vmem:[%s539_s2 + $0x8] sm:$0xff]  ;;  %v144_v10 = vld [vmem:[%s540_s4 + $0x10] sm:$0xff] }
   0x4   :  { %374 = vmatprep.subr.bf16.mxu0 %v37_v3  ;;  %48 = vperm.xlu1 %408, %v42_v7   ;;  %v145_v11 = vld [vmem:[%s540_s4 + $0x18] sm:$0xff]  ;;  %v142_v12 = vld [vmem:[%s540_s4] sm:$0xff]  ;;  %v143_v13 = vld [vmem:[%s540_s4 + $0x8] sm:$0xff] }
   0x5   :  { %375 = vmatpush3.bf16.msra.mxu0 %v37_v3  ;;  %v289_v14 = vld [vmem:[%s541_s8] sm:$0xf]  ;;  %v412_v35 = vld [vmem:[%s543_s3 + $0x8] sm:$0xff]  }
   0x6   :  { %63 = vperm.xlu0 %407, %v45_v8   ;;  %v239_v15 = vld [vmem:[%s542_s6] sm:$0xf]  ;;  %388 = vmatprep.subr.bf16.mxu0 %v414_v36 }
   0x7   :  { %v411_v16 = vld [vmem:[%s543_s3] sm:$0xff]  }
   0x8   :  { %377 = vmatmul.mubr.msk.bf16.vlgmr.msra.gmra.mxu0 %vm76_vm0, %v410_v6  ;;  %53 = vperm.xlu1 %408, %v43_v9   ;;  %v238_v55 = vld [vmem:[%s544_s5] sm:$0x3] }
   0x9   :  { %384 = vmatprep.mubr.msk.bf16.mxu1 %vm176_vm1, %v411_v16  ;;  %392 = vmatprep.mubr.msk.bf16.mxu0 %vm415_vm2, %v414_v36  ;;  %v288_v56 = vld [vmem:[%s545_s7] sm:$0x3] }
   0xa   :  { %158 = vperm.xlu0 %407, %v144_v10  }
   0xc   :  { %163 = vperm.xlu1 %408, %v145_v11  }
   0xe   :  { %148 = vperm.xlu0 %407, %v142_v12  }
  0x10   :  { %153 = vperm.xlu1 %408, %v143_v13  }
  0x12   :  { %292 = vperm.xlu0 %407, %v289_v14  }
  0x14   :  { %242 = vperm.xlu1 %408, %v239_v15  }
  0x7d   :  { %v59_v17 = vpop.permute.xlu0 %58 }
  0x7f   :  { %v49_v18 = vpop.permute.xlu1 %48 }
  0x81   :  { %v64_v22 = vpop.permute.xlu0 %63 }
  0x83   :  { %v54_v26 = vpop.permute.xlu1 %53 }
  0x85   :  { %v159_v37 = vpop.permute.xlu0 %158 }
  0x87   :  { %v164_v38 = vpop.permute.xlu1 %163 }
  0x89   :  { %v149_v43 = vpop.permute.xlu0 %148 }
  0x8b   :  { %v154_v45 = vpop.permute.xlu1 %153 }
  0x8d   :  { %v293_v57 = vpop.permute.xlu0 %292 }
  0x8f   :  { %v243_v58 = vpop.permute.xlu1 %242 }
  0xc8   :  { %v378_v19 = vpop.f32.mrf.mxu0 }
  0xc9   :  { %v126_v21 = vadd.f32 %v378_v19, %v59_v17 }
  0xca   :  { %v117_v20 = vpop.f32.mrf.mxu0 }
  0xcb   :  { %v118_v24 = vadd.f32 %v117_v20, %v49_v18  ;;  %v134_v28 = vmax.f32 %v126_v21, 0.0 }
  0xcc   :  { %v379_v23 = vpop.f32.mrf.mxu0 }
  0xcd   :  { %v129_v25 = vadd.f32 %v379_v23, %v64_v22  ;;  %v132_v31 = vmax.f32 %v118_v24, 0.0 }
  0xce   :  { %v120_v27 = vpop.f32.mrf.mxu0 }
  0xcf   :  { %v135_v29 = vmax.f32 %v129_v25, 0.0  ;;  %v121_v30 = vadd.f32 %v120_v27, %v54_v26 }
  0xd1   :  { %v133_v32 = vmax.f32 %v121_v30, 0.0  ;;  %v141_v33 = vpack.c.bf16 %v135_v29, %v134_v28 }
  0xd3   :  { %v140_v34 = vpack.c.bf16 %v133_v32, %v132_v31  ;;  %380 = vmatprep.subr.bf16.mxu1 %v141_v33 }
  0xd4   :  { %381 = vmatpush3.bf16.msra.mxu1 %v141_v33 }
  0xd5   :  { %382 = vmatprep.subr.bf16.mxu1 %v140_v34 }
  0xd8   :  { %383 = vmatpush3.bf16.msra.mxu1 %v140_v34 }
  0xd9   :  { %396 = vmatprep.subr.bf16.mxu1 %v414_v36 }
  0xdb   :  { %385 = vmatmul.mubr.msk.bf16.vlgmr.msra.gmra.mxu1 %vm176_vm1, %v412_v35 }
  0xdc   :  { %400 = vmatprep.mubr.msk.bf16.mxu1 %vm415_vm2, %v414_v36 }
 0x19b   :  { %v386_v39 = vpop.f32.mrf.mxu1 }
 0x19c   :  { %v226_v41 = vadd.f32 %v386_v39, %v159_v37 }
 0x19d   :  { %v217_v40 = vpop.f32.mrf.mxu1 }
 0x19e   :  { %v234_v47 = vmax.f32 %v226_v41, 0.0  ;;  %v218_v48 = vadd.f32 %v217_v40, %v149_v43 }
 0x19f   :  { %v387_v42 = vpop.f32.mrf.mxu1 }
 0x1a0   :  { %v229_v44 = vadd.f32 %v387_v42, %v164_v38  ;;  %v232_v53 = vmax.f32 %v218_v48, 0.0 }
 0x1a1   :  { %v220_v46 = vpop.f32.mrf.mxu1 }
 0x1a2   :  { %v235_v49 = vmax.f32 %v229_v44, 0.0  ;;  %v221_v50 = vadd.f32 %v220_v46, %v154_v45 }
 0x1a4   :  { %v237_v51 = vpack.c.bf16 %v235_v49, %v234_v47  ;;  %v233_v52 = vmax.f32 %v221_v50, 0.0 }
 0x1a6   :  { %389 = vmatpush3.bf16.msra.mxu0 %v237_v51  ;;  %397 = vmatpush3.bf16.msra.mxu1 %v237_v51  ;;  %v236_v54 = vpack.c.bf16 %v233_v52, %v232_v53 }
 0x1a7   :  { %390 = vmatprep.subr.bf16.mxu0 %v414_v36  ;;  %398 = vmatprep.subr.bf16.mxu1 %v414_v36 }
 0x1aa   :  { %391 = vmatpush3.bf16.msra.mxu0 %v236_v54  ;;  %399 = vmatpush3.bf16.msra.mxu1 %v236_v54 }
 0x1ad   :  { %393 = vmatmul.mubr.msk.bf16.vlgmr.msra.gmra.mxu0 %vm176_vm1, %v238_v55  ;;  %401 = vmatmul.mubr.msk.bf16.vlgmr.msra.gmra.mxu1 %vm176_vm1, %v288_v56 }
 0x26d   :  { %v282_v59 = vpop.f32.mrf.mxu0  ;;  %v332_v60 = vpop.f32.mrf.mxu1 }
 0x26e   :  { %v283_v61 = vadd.f32 %v282_v59, %v243_v58  ;;  %v333_v62 = vadd.f32 %v332_v60, %v293_v57 }
 0x26f   :  { %v394_v63 = vpop.f32.mrf.mxu0  ;;  %v402_v0 = vpop.f32.mrf.mxu1 }
 0x270   :  { %339 = vst.msk [vmem:[%s546_s9] sm:$0xf] %vm338_vm3, %v283_v61  ;;  %v340_v1 = vmax.f32 %v333_v62, -20.0 }
 0x271   :  { %v285_v2 = vpop.f32.mrf.mxu0  ;;  %v335_v3 = vpop.f32.mrf.mxu1 }
 0x272   :  { %v341_v4 = vmin.f32 %v340_v1, 2.0 }
 0x273   :  { %v395_v5 = vpop.f32.mrf.mxu0  ;;  %v403_v6 = vpop.f32.mrf.mxu1 }
 0x274   :  { %342 = vst.msk [vmem:[%s547_s10] sm:$0xf] %vm338_vm3, %v341_v4 }

</bundles_post_ra>
